<compile_context>
chip_gen: v6e
topology: v6e:2x2x1
jax: 0.10.0
libtpu: 0.0.40
codegen_flags: <defaults>
</compile_context>

<pallas_src>
import math

import jax
import jax.numpy as jnp
from jax import lax
from jax.experimental import pallas as pl
from jax.experimental.pallas import tpu as pltpu


def positional_attention_head_kernel(
        x_ref, bias_ref, gamma_ref, beta_ref, wqkv_ref,
        cos_ref, sin_signed_ref, out_ref, probs_ref):
    """One batch element per grid step; all H heads are processed in the step."""
    S = x_ref.shape[1]
    H = probs_ref.shape[1]
    HD = x_ref.shape[2]
    D = HD // H
    half = D // 2

    x = x_ref[0]                                              # (S, H*D) f32

    # Gather the per-head column blocks (static, 128-lane-aligned slices) into a
    # head-major (H*S, D) slab so LayerNorm and the fused QKV matmul run once
    # with MXU M-dim = H*S.
    xh = jnp.concatenate([x[:, h * D:(h + 1) * D] for h in range(H)], axis=0)

    # Pre-attention LayerNorm over head_dim (eps = 1e-5, PyTorch default).
    mean = jnp.mean(xh, axis=-1, keepdims=True)
    var = jnp.mean(jnp.square(xh - mean), axis=-1, keepdims=True)
    xn = (xh - mean) * lax.rsqrt(var + 1e-5)
    xn = xn * gamma_ref[...] + beta_ref[...]                  # (H*S, D)

    # Fused Q/K/V projection: one MXU matmul (H*S, D) @ (D, 3D).
    # 1/sqrt(D) is already folded into the Wq columns in the wrapper.
    qkv = jnp.dot(xn, wqkv_ref[...], preferred_element_type=jnp.float32)
    q = qkv[:, :D]                                            # (H*S, D)
    k = qkv[:, D:2 * D]
    v = qkv[:, 2 * D:]

    # Rotary embedding: t*cos + rotate_half(t)*sin.
    # rotate_half(t) == roll(t, D/2, lanes) * [-1,...,-1,+1,...,+1]; the sign is
    # folded into sin_signed in the wrapper so the roll stays pure XLU work.
    cos = cos_ref[...]                                        # (H*S, D)
    sin_s = sin_signed_ref[...]                               # (H*S, D)
    q = q * cos + pltpu.roll(q, shift=half, axis=1) * sin_s
    k = k * cos + pltpu.roll(k, shift=half, axis=1) * sin_s

    bias = bias_ref[0]                                        # (1, S): 0 / -inf

    out_heads = []
    for h in range(H):                                        # static unroll
        qh = q[h * S:(h + 1) * S]                             # (S, D) sublane slice
        kh = k[h * S:(h + 1) * S]
        vh = v[h * S:(h + 1) * S]

        # Scaled attention scores (scale folded into Wq) + additive mask bias.
        scores = lax.dot_general(
            qh, kh, dimension_numbers=(((1,), (1,)), ((), ())),
            preferred_element_type=jnp.float32) + bias        # (S, S)

        # Safeguard softmax (matches torch reference: exp(x - max) / (sum + 1e-7)).
        m = jnp.max(scores, axis=-1, keepdims=True)
        e = jnp.exp(scores - m)
        s = jnp.sum(e, axis=-1, keepdims=True)
        probs = e / (s + 1e-7)
        probs_ref[0, h] = probs.astype(probs_ref.dtype)

        out_heads.append(jnp.dot(probs, vh, preferred_element_type=jnp.float32))

    # Single lane-dense store back in the native (S, H*D) layout.
    out_ref[0] = jnp.concatenate(out_heads, axis=-1).astype(out_ref.dtype)


def positional_attention_head(x, attention_mask, gamma, beta, wq, wk, wv, n_heads):
    """x: (B, S, hidden). attention_mask: (B, S) bool (True = attend).
    wq/wk/wv: (head_dim, head_dim) in PyTorch (out, in) convention.
    Returns (out (B, S, hidden), attn_probs (B, n_heads, S, S))."""
    B, S, hidden = x.shape
    H = n_heads
    D = hidden // n_heads

    # Rotary tables: pure function of (S, D); tiled to the head-major row order
    # (row h*S + s uses cos/sin of position s) used inside the kernel.
    inv_freq = 1.0 / (10000.0 ** (jnp.arange(0, D, 2, dtype=jnp.float32) / D))
    t = jnp.arange(S, dtype=jnp.float32)
    freqs = jnp.einsum('i,j->ij', t, inv_freq)                 # (S, D/2)
    emb = jnp.concatenate([freqs, freqs], axis=-1)             # (S, D)
    cos = jnp.cos(emb)
    sign = jnp.concatenate([-jnp.ones((D // 2,), jnp.float32),
                            jnp.ones((D // 2,), jnp.float32)])
    sin_signed = jnp.sin(emb) * sign                           # rotate_half sign folded in
    cos_t = jnp.tile(cos, (H, 1))                              # (H*S, D)
    sin_t = jnp.tile(sin_signed, (H, 1))                       # (H*S, D)

    # Additive mask bias: 0 where attended, -inf where padded (== masked_fill(-inf)).
    bias = jnp.where(attention_mask, 0.0, -jnp.inf).astype(jnp.float32).reshape(B, 1, S)

    gamma2 = gamma.reshape(1, D)
    beta2 = beta.reshape(1, D)

    # Fused QKV weight, (in, out) convention, with 1/sqrt(D) folded into Wq.
    scale = 1.0 / math.sqrt(D)
    wqkv = jnp.concatenate([wq.T * scale, wk.T, wv.T], axis=1)  # (D, 3D)

    flops = B * H * (6 * S * D * D + 4 * S * S * D)
    bytes_accessed = 4 * (2 * B * S * hidden      # x + out
                          + B * S                 # mask bias
                          + 3 * D * D             # fused weights
                          + 2 * H * S * D + 2 * D  # rotary tables + LN params
                          + B * H * S * S)        # probs

    out, probs = pl.pallas_call(
        positional_attention_head_kernel,
        out_shape=(jax.ShapeDtypeStruct((B, S, hidden), jnp.float32),
                   jax.ShapeDtypeStruct((B, H, S, S), jnp.float32)),
        grid_spec=pltpu.PrefetchScalarGridSpec(
            num_scalar_prefetch=0,
            grid=(B,),
            in_specs=[
                pl.BlockSpec((1, S, hidden), lambda b: (b, 0, 0)),   # x (native layout)
                pl.BlockSpec((1, 1, S), lambda b: (b, 0, 0)),        # mask bias
                pl.BlockSpec((1, D), lambda b: (0, 0)),              # ln gamma (resident)
                pl.BlockSpec((1, D), lambda b: (0, 0)),              # ln beta (resident)
                pl.BlockSpec((D, 3 * D), lambda b: (0, 0)),          # Wqkv (resident)
                pl.BlockSpec((H * S, D), lambda b: (0, 0)),          # cos (resident)
                pl.BlockSpec((H * S, D), lambda b: (0, 0)),          # sin*sign (resident)
            ],
            out_specs=[
                pl.BlockSpec((1, S, hidden), lambda b: (b, 0, 0)),   # out (native layout)
                pl.BlockSpec((1, H, S, S), lambda b: (b, 0, 0, 0)),  # attn_probs
            ],
        ),
        compiler_params=pltpu.CompilerParams(
            dimension_semantics=("parallel",),
            vmem_limit_bytes=32 * 1024 * 1024),
        cost_estimate=pl.CostEstimate(
            flops=flops, transcendentals=B * H * S * S,
            bytes_accessed=bytes_accessed),
    )(x, bias, gamma2, beta2, wqkv, cos_t, sin_t)

    return out, probs


if __name__ == "__main__":
    # Small shapes consistent with the module; head_dim = 128 keeps lanes dense.
    batch, seq, hidden_dim, n_heads = 2, 8, 256, 2
    head_dim = hidden_dim // n_heads

    key = jax.random.PRNGKey(0)
    k1, k2, k3, k4, k5, k6 = jax.random.split(key, 6)

    x = jax.random.normal(k1, (batch, seq, hidden_dim), jnp.float32)
    # attention_mask: True = attend. Batch 1 has the last two positions padded.
    lengths = jnp.array([seq, seq - 2])
    attention_mask = jnp.arange(seq)[None, :] < lengths[:, None]      # (B, S) bool

    gamma = 1.0 + 0.1 * jax.random.normal(k2, (head_dim,), jnp.float32)
    beta = 0.1 * jax.random.normal(k3, (head_dim,), jnp.float32)
    wscale = 1.0 / math.sqrt(head_dim)
    wq = jax.random.normal(k4, (head_dim, head_dim), jnp.float32) * wscale
    wk = jax.random.normal(k5, (head_dim, head_dim), jnp.float32) * wscale
    wv = jax.random.normal(k6, (head_dim, head_dim), jnp.float32) * wscale

    out, probs = positional_attention_head(x, attention_mask, gamma, beta,
                                           wq, wk, wv, n_heads)
    out = jax.block_until_ready(out)
    probs = jax.block_until_ready(probs)

    # Plain-JAX reference (mirrors the PyTorch forward).
    def ref_forward(xin, mask_bool):
        xh = xin.reshape(batch, seq, n_heads, head_dim)
        m = xh.mean(-1, keepdims=True)
        var = ((xh - m) ** 2).mean(-1, keepdims=True)
        xn = (xh - m) / jnp.sqrt(var + 1e-5) * gamma + beta
        q = xn @ wq.T
        k = xn @ wk.T
        v = xn @ wv.T
        inv_freq = 1.0 / (10000.0 ** (jnp.arange(0, head_dim, 2,
                                                 dtype=jnp.float32) / head_dim))
        t = jnp.arange(seq, dtype=jnp.float32)
        freqs = jnp.einsum('i,j->ij', t, inv_freq)
        emb = jnp.concatenate([freqs, freqs], axis=-1)
        cos = jnp.cos(emb)[None, :, None, :]
        sin = jnp.sin(emb)[None, :, None, :]

        def rot_half(u):
            u1, u2 = jnp.split(u, 2, axis=-1)
            return jnp.concatenate([-u2, u1], axis=-1)

        q = q * cos + rot_half(q) * sin
        k = k * cos + rot_half(k) * sin
        scores = jnp.einsum('bqhd,bkhd->bhqk', q, k) / math.sqrt(head_dim)
        scores = jnp.where(mask_bool[:, None, None, :], scores, -jnp.inf)
        mx = scores.max(-1, keepdims=True)
        e = jnp.exp(scores - mx)
        s = e.sum(-1, keepdims=True)
        p = e / (s + 1e-7)
        o = jnp.einsum('bhqk,bkhd->bqhd', p, v)
        return o.reshape(batch, seq, hidden_dim), p

    ref_out, ref_probs = ref_forward(x, attention_mask)

    assert out.shape == (batch, seq, hidden_dim)
    assert probs.shape == (batch, n_heads, seq, seq)
    assert jnp.allclose(out, ref_out, atol=1e-4, rtol=1e-4)
    assert jnp.allclose(probs, ref_probs, atol=1e-5, rtol=1e-4)

    print("KERNEL_OK")
</pallas_src>

<mosaic_0001>
module attributes {stable_mosaic.version = 11 : i64} {
  func.func @positional_attention_head_kernel(%arg0: i32, %arg1: memref<1x8x256xf32, #tpu.memory_space<vmem>>, %arg2: memref<1x1x8xf32, #tpu.memory_space<vmem>>, %arg3: memref<1x128xf32, #tpu.memory_space<vmem>>, %arg4: memref<1x128xf32, #tpu.memory_space<vmem>>, %arg5: memref<128x384xf32, #tpu.memory_space<vmem>>, %arg6: memref<16x128xf32, #tpu.memory_space<vmem>>, %arg7: memref<16x128xf32, #tpu.memory_space<vmem>>, %arg8: memref<1x8x256xf32, #tpu.memory_space<vmem>>, %arg9: memref<1x2x8x8xf32, #tpu.memory_space<vmem>>) attributes {dimension_semantics = [#tpu.dimension_semantics<parallel>], iteration_bounds = array<i64: 2>, scalar_prefetch = 0 : i64, scratch_operands = 0 : i64, tpu.core_type = #tpu.core_type<tc>, window_params = [{transform_indices = @transform_0, window_bounds = array<i64: 1, 8, 256>}, {transform_indices = @transform_1, window_bounds = array<i64: 1, 1, 8>}, {pipeline_mode = #tpu.pipeline_mode<synchronous>, transform_indices = @transform_2, window_bounds = array<i64: 1, 128>}, {pipeline_mode = #tpu.pipeline_mode<synchronous>, transform_indices = @transform_3, window_bounds = array<i64: 1, 128>}, {pipeline_mode = #tpu.pipeline_mode<synchronous>, transform_indices = @transform_4, window_bounds = array<i64: 128, 384>}, {pipeline_mode = #tpu.pipeline_mode<synchronous>, transform_indices = @transform_5, window_bounds = array<i64: 16, 128>}, {pipeline_mode = #tpu.pipeline_mode<synchronous>, transform_indices = @transform_6, window_bounds = array<i64: 16, 128>}, {transform_indices = @transform_7, window_bounds = array<i64: 1, 8, 256>}, {transform_indices = @transform_8, window_bounds = array<i64: 1, 2, 8, 8>}]} {
    %c0 = arith.constant 0 : index
    %c0_0 = arith.constant 0 : index
    %c0_1 = arith.constant 0 : index
    %0 = vector.load %arg1[%c0, %c0_0, %c0_1] : memref<1x8x256xf32, #tpu.memory_space<vmem>>, vector<1x8x256xf32>
    %1 = vector.shape_cast %0 : vector<1x8x256xf32> to vector<8x256xf32>
    %2 = vector.extract_strided_slice %1 {offsets = [0, 0], sizes = [8, 128], strides = [1, 1]} : vector<8x256xf32> to vector<8x128xf32>
    %3 = vector.extract_strided_slice %1 {offsets = [0, 128], sizes = [8, 128], strides = [1, 1]} : vector<8x256xf32> to vector<8x128xf32>
    %4 = tpu.concatenate %2, %3 in 0 : vector<8x128xf32>, vector<8x128xf32> -> vector<16x128xf32>
    %cst = arith.constant dense<0.000000e+00> : vector<16xf32>
    %5 = vector.multi_reduction <add>, %4, %cst [1] : vector<16x128xf32> to vector<16xf32>
    %6 = vector.shape_cast %5 : vector<16xf32> to vector<16x1xf32>
    %cst_2 = arith.constant 1.280000e+02 : f32
    %7 = vector.broadcast %cst_2 : f32 to vector<16x1xf32>
    %8 = arith.divf %6, %7 : vector<16x1xf32>
    %9 = vector.broadcast %8 : vector<16x1xf32> to vector<16x128xf32>
    %10 = arith.subf %4, %9 : vector<16x128xf32>
    %11 = arith.mulf %10, %10 : vector<16x128xf32>
    %cst_3 = arith.constant dense<0.000000e+00> : vector<16xf32>
    %12 = vector.multi_reduction <add>, %11, %cst_3 [1] : vector<16x128xf32> to vector<16xf32>
    %13 = vector.shape_cast %12 : vector<16xf32> to vector<16x1xf32>
    %cst_4 = arith.constant 1.280000e+02 : f32
    %14 = vector.broadcast %cst_4 : f32 to vector<16x1xf32>
    %15 = arith.divf %13, %14 : vector<16x1xf32>
    %16 = vector.broadcast %8 : vector<16x1xf32> to vector<16x128xf32>
    %17 = arith.subf %4, %16 : vector<16x128xf32>
    %cst_5 = arith.constant 9.99999974E-6 : f32
    %18 = vector.broadcast %cst_5 : f32 to vector<16x1xf32>
    %19 = arith.addf %15, %18 : vector<16x1xf32>
    %20 = math.rsqrt %19 : vector<16x1xf32>
    %21 = vector.broadcast %20 : vector<16x1xf32> to vector<16x128xf32>
    %22 = arith.mulf %17, %21 : vector<16x128xf32>
    %c0_6 = arith.constant 0 : index
    %c0_7 = arith.constant 0 : index
    %23 = vector.load %arg3[%c0_6, %c0_7] : memref<1x128xf32, #tpu.memory_space<vmem>>, vector<1x128xf32>
    %24 = vector.broadcast %23 : vector<1x128xf32> to vector<16x128xf32>
    %25 = arith.mulf %22, %24 : vector<16x128xf32>
    %c0_8 = arith.constant 0 : index
    %c0_9 = arith.constant 0 : index
    %26 = vector.load %arg4[%c0_8, %c0_9] : memref<1x128xf32, #tpu.memory_space<vmem>>, vector<1x128xf32>
    %27 = vector.broadcast %26 : vector<1x128xf32> to vector<16x128xf32>
    %28 = arith.addf %25, %27 : vector<16x128xf32>
    %c0_10 = arith.constant 0 : index
    %c0_11 = arith.constant 0 : index
    %29 = vector.load %arg5[%c0_10, %c0_11] : memref<128x384xf32, #tpu.memory_space<vmem>>, vector<128x384xf32>
    %cst_12 = arith.constant dense<0.000000e+00> : vector<16x384xf32>
    %30 = tpu.matmul %28, %29, %cst_12 {dimension_numbers = #tpu.dot_dimension_numbers<[1], [0], [0], [1], [0, 0, 1, 1], [], []>} : vector<16x128xf32>, vector<128x384xf32>, vector<16x384xf32> -> vector<16x384xf32>
    %31 = vector.extract_strided_slice %30 {offsets = [0, 0], sizes = [16, 128], strides = [1, 1]} : vector<16x384xf32> to vector<16x128xf32>
    %32 = vector.extract_strided_slice %30 {offsets = [0, 128], sizes = [16, 128], strides = [1, 1]} : vector<16x384xf32> to vector<16x128xf32>
    %33 = vector.extract_strided_slice %30 {offsets = [0, 256], sizes = [16, 128], strides = [1, 1]} : vector<16x384xf32> to vector<16x128xf32>
    %c0_13 = arith.constant 0 : index
    %c0_14 = arith.constant 0 : index
    %34 = vector.load %arg6[%c0_13, %c0_14] : memref<16x128xf32, #tpu.memory_space<vmem>>, vector<16x128xf32>
    %c0_15 = arith.constant 0 : index
    %c0_16 = arith.constant 0 : index
    %35 = vector.load %arg7[%c0_15, %c0_16] : memref<16x128xf32, #tpu.memory_space<vmem>>, vector<16x128xf32>
    %36 = arith.mulf %31, %34 : vector<16x128xf32>
    %c64_i32 = arith.constant 64 : i32
    %37 = tpu.dynamic_rotate %31 by %c64_i32 dim 1 : vector<16x128xf32>, i32 -> vector<16x128xf32>
    %38 = arith.mulf %37, %35 : vector<16x128xf32>
    %39 = arith.addf %36, %38 : vector<16x128xf32>
    %40 = arith.mulf %32, %34 : vector<16x128xf32>
    %c64_i32_17 = arith.constant 64 : i32
    %41 = tpu.dynamic_rotate %32 by %c64_i32_17 dim 1 : vector<16x128xf32>, i32 -> vector<16x128xf32>
    %42 = arith.mulf %41, %35 : vector<16x128xf32>
    %43 = arith.addf %40, %42 : vector<16x128xf32>
    %c0_18 = arith.constant 0 : index
    %c0_19 = arith.constant 0 : index
    %c0_20 = arith.constant 0 : index
    %44 = vector.load %arg2[%c0_18, %c0_19, %c0_20] : memref<1x1x8xf32, #tpu.memory_space<vmem>>, vector<1x1x8xf32>
    %45 = vector.shape_cast %44 : vector<1x1x8xf32> to vector<1x8xf32>
    %46 = vector.extract_strided_slice %39 {offsets = [0, 0], sizes = [8, 128], strides = [1, 1]} : vector<16x128xf32> to vector<8x128xf32>
    %47 = vector.extract_strided_slice %43 {offsets = [0, 0], sizes = [8, 128], strides = [1, 1]} : vector<16x128xf32> to vector<8x128xf32>
    %48 = vector.extract_strided_slice %33 {offsets = [0, 0], sizes = [8, 128], strides = [1, 1]} : vector<16x128xf32> to vector<8x128xf32>
    %cst_21 = arith.constant dense<0.000000e+00> : vector<8x8xf32>
    %49 = tpu.matmul %46, %47, %cst_21 {dimension_numbers = #tpu.dot_dimension_numbers<[1], [1], [0], [0], [0, 0, 1, 0], [], []>} : vector<8x128xf32>, vector<8x128xf32>, vector<8x8xf32> -> vector<8x8xf32>
    %50 = vector.broadcast %45 : vector<1x8xf32> to vector<8x8xf32>
    %51 = arith.addf %49, %50 : vector<8x8xf32>
    %cst_22 = arith.constant dense<0xFF800000> : vector<8xf32>
    %52 = vector.multi_reduction <maximumf>, %51, %cst_22 [1] : vector<8x8xf32> to vector<8xf32>
    %53 = vector.shape_cast %52 : vector<8xf32> to vector<8x1xf32>
    %54 = vector.broadcast %53 : vector<8x1xf32> to vector<8x8xf32>
    %55 = arith.subf %51, %54 : vector<8x8xf32>
    %56 = math.exp %55 : vector<8x8xf32>
    %cst_23 = arith.constant dense<0.000000e+00> : vector<8xf32>
    %57 = vector.multi_reduction <add>, %56, %cst_23 [1] : vector<8x8xf32> to vector<8xf32>
    %58 = vector.shape_cast %57 : vector<8xf32> to vector<8x1xf32>
    %cst_24 = arith.constant 1.000000e-07 : f32
    %59 = vector.broadcast %cst_24 : f32 to vector<8x1xf32>
    %60 = arith.addf %58, %59 : vector<8x1xf32>
    %61 = vector.broadcast %60 : vector<8x1xf32> to vector<8x8xf32>
    %62 = arith.divf %56, %61 : vector<8x8xf32>
    %c0_25 = arith.constant 0 : index
    %c0_26 = arith.constant 0 : index
    %c0_27 = arith.constant 0 : index
    %c0_28 = arith.constant 0 : index
    %63 = vector.load %arg9[%c0_25, %c0_26, %c0_27, %c0_28] : memref<1x2x8x8xf32, #tpu.memory_space<vmem>>, vector<1x1x8x8xf32>
    %64 = vector.shape_cast %63 : vector<1x1x8x8xf32> to vector<8x8xf32>
    %65 = vector.shape_cast %62 : vector<8x8xf32> to vector<1x1x8x8xf32>
    tpu.vector_store %arg9[%c0_25, %c0_26, %c0_27, %c0_28], %65 {strides = array<i32>} : memref<1x2x8x8xf32, #tpu.memory_space<vmem>>, vector<1x1x8x8xf32>,
    %cst_29 = arith.constant dense<0.000000e+00> : vector<8x128xf32>
    %66 = tpu.matmul %62, %48, %cst_29 {dimension_numbers = #tpu.dot_dimension_numbers<[1], [0], [0], [1], [0, 0, 1, 1], [], []>} : vector<8x8xf32>, vector<8x128xf32>, vector<8x128xf32> -> vector<8x128xf32>
    %67 = vector.extract_strided_slice %39 {offsets = [8, 0], sizes = [8, 128], strides = [1, 1]} : vector<16x128xf32> to vector<8x128xf32>
    %68 = vector.extract_strided_slice %43 {offsets = [8, 0], sizes = [8, 128], strides = [1, 1]} : vector<16x128xf32> to vector<8x128xf32>
    %69 = vector.extract_strided_slice %33 {offsets = [8, 0], sizes = [8, 128], strides = [1, 1]} : vector<16x128xf32> to vector<8x128xf32>
    %cst_30 = arith.constant dense<0.000000e+00> : vector<8x8xf32>
    %70 = tpu.matmul %67, %68, %cst_30 {dimension_numbers = #tpu.dot_dimension_numbers<[1], [1], [0], [0], [0, 0, 1, 0], [], []>} : vector<8x128xf32>, vector<8x128xf32>, vector<8x8xf32> -> vector<8x8xf32>
    %71 = vector.broadcast %45 : vector<1x8xf32> to vector<8x8xf32>
    %72 = arith.addf %70, %71 : vector<8x8xf32>
    %cst_31 = arith.constant dense<0xFF800000> : vector<8xf32>
    %73 = vector.multi_reduction <maximumf>, %72, %cst_31 [1] : vector<8x8xf32> to vector<8xf32>
    %74 = vector.shape_cast %73 : vector<8xf32> to vector<8x1xf32>
    %75 = vector.broadcast %74 : vector<8x1xf32> to vector<8x8xf32>
    %76 = arith.subf %72, %75 : vector<8x8xf32>
    %77 = math.exp %76 : vector<8x8xf32>
    %cst_32 = arith.constant dense<0.000000e+00> : vector<8xf32>
    %78 = vector.multi_reduction <add>, %77, %cst_32 [1] : vector<8x8xf32> to vector<8xf32>
    %79 = vector.shape_cast %78 : vector<8xf32> to vector<8x1xf32>
    %cst_33 = arith.constant 1.000000e-07 : f32
    %80 = vector.broadcast %cst_33 : f32 to vector<8x1xf32>
    %81 = arith.addf %79, %80 : vector<8x1xf32>
    %82 = vector.broadcast %81 : vector<8x1xf32> to vector<8x8xf32>
    %83 = arith.divf %77, %82 : vector<8x8xf32>
    %c0_34 = arith.constant 0 : index
    %c1 = arith.constant 1 : index
    %c0_35 = arith.constant 0 : index
    %c0_36 = arith.constant 0 : index
    %84 = vector.load %arg9[%c0_34, %c1, %c0_35, %c0_36] : memref<1x2x8x8xf32, #tpu.memory_space<vmem>>, vector<1x1x8x8xf32>
    %85 = vector.shape_cast %84 : vector<1x1x8x8xf32> to vector<8x8xf32>
    %86 = vector.shape_cast %83 : vector<8x8xf32> to vector<1x1x8x8xf32>
    tpu.vector_store %arg9[%c0_34, %c1, %c0_35, %c0_36], %86 {strides = array<i32>} : memref<1x2x8x8xf32, #tpu.memory_space<vmem>>, vector<1x1x8x8xf32>,
    %cst_37 = arith.constant dense<0.000000e+00> : vector<8x128xf32>
    %87 = tpu.matmul %83, %69, %cst_37 {dimension_numbers = #tpu.dot_dimension_numbers<[1], [0], [0], [1], [0, 0, 1, 1], [], []>} : vector<8x8xf32>, vector<8x128xf32>, vector<8x128xf32> -> vector<8x128xf32>
    %88 = tpu.concatenate %66, %87 in 1 : vector<8x128xf32>, vector<8x128xf32> -> vector<8x256xf32>
    %c0_38 = arith.constant 0 : index
    %c0_39 = arith.constant 0 : index
    %c0_40 = arith.constant 0 : index
    %89 = vector.load %arg8[%c0_38, %c0_39, %c0_40] : memref<1x8x256xf32, #tpu.memory_space<vmem>>, vector<1x8x256xf32>
    %90 = vector.shape_cast %89 : vector<1x8x256xf32> to vector<8x256xf32>
    %91 = vector.shape_cast %88 : vector<8x256xf32> to vector<1x8x256xf32>
    tpu.vector_store %arg8[%c0_38, %c0_39, %c0_40], %91 {strides = array<i32>} : memref<1x8x256xf32, #tpu.memory_space<vmem>>, vector<1x8x256xf32>,
    return
  }
  func.func @transform_0(%arg0: i32) -> (i32, i32, i32) {
    %c0_i32 = arith.constant 0 : i32
    %c0_i32_0 = arith.constant 0 : i32
    %c0_i32_1 = arith.constant 0 : i32
    return %arg0, %c0_i32, %c0_i32_0 : i32, i32, i32
  }
  func.func @transform_1(%arg0: i32) -> (i32, i32, i32) {
    %c0_i32 = arith.constant 0 : i32
    %c0_i32_0 = arith.constant 0 : i32
    %c0_i32_1 = arith.constant 0 : i32
    return %arg0, %c0_i32, %c0_i32_0 : i32, i32, i32
  }
  func.func @transform_2(%arg0: i32) -> (i32, i32) {
    %c0_i32 = arith.constant 0 : i32
    %c0_i32_0 = arith.constant 0 : i32
    %c0_i32_1 = arith.constant 0 : i32
    return %c0_i32, %c0_i32_0 : i32, i32
  }
  func.func @transform_3(%arg0: i32) -> (i32, i32) {
    %c0_i32 = arith.constant 0 : i32
    %c0_i32_0 = arith.constant 0 : i32
    %c0_i32_1 = arith.constant 0 : i32
    return %c0_i32, %c0_i32_0 : i32, i32
  }
  func.func @transform_4(%arg0: i32) -> (i32, i32) {
    %c0_i32 = arith.constant 0 : i32
    %c0_i32_0 = arith.constant 0 : i32
    %c0_i32_1 = arith.constant 0 : i32
    return %c0_i32, %c0_i32_0 : i32, i32
  }
  func.func @transform_5(%arg0: i32) -> (i32, i32) {
    %c0_i32 = arith.constant 0 : i32
    %c0_i32_0 = arith.constant 0 : i32
    %c0_i32_1 = arith.constant 0 : i32
    return %c0_i32, %c0_i32_0 : i32, i32
  }
  func.func @transform_6(%arg0: i32) -> (i32, i32) {
    %c0_i32 = arith.constant 0 : i32
    %c0_i32_0 = arith.constant 0 : i32
    %c0_i32_1 = arith.constant 0 : i32
    return %c0_i32, %c0_i32_0 : i32, i32
  }
  func.func @transform_7(%arg0: i32) -> (i32, i32, i32) {
    %c0_i32 = arith.constant 0 : i32
    %c0_i32_0 = arith.constant 0 : i32
    %c0_i32_1 = arith.constant 0 : i32
    return %arg0, %c0_i32, %c0_i32_0 : i32, i32, i32
  }
  func.func @transform_8(%arg0: i32) -> (i32, i32, i32, i32) {
    %c0_i32 = arith.constant 0 : i32
    %c0_i32_0 = arith.constant 0 : i32
    %c0_i32_1 = arith.constant 0 : i32
    %c0_i32_2 = arith.constant 0 : i32
    return %arg0, %c0_i32, %c0_i32_0, %c0_i32_1 : i32, i32, i32, i32
  }
}

</mosaic_0001>

<bundles_post_ra>
// kernel: tpu_custom_call.1
= control target key start
LH: loop header
LB: loop body
LE: loop exit
PB: predicated region body
PF: predicated region fallthrough
CT: control target
= control target key end

     0   :  { %s2027_s0 = inlined_call_operand.hbm [shape: f32[2,8,256], index: 0, kind: input, shape index: {}]   ;;  %s2028_s1 = inlined_call_operand.hbm [shape: f32[2,1,8], index: 1, kind: input, shape index: {}]   ;;  %s2029_s2 = inlined_call_operand.vmem [shape: f32[1,128], index: 2, kind: input, shape index: {}]   ;;  %s2030_s3 = inlined_call_operand.vmem [shape: f32[1,128], index: 3, kind: input, shape index: {}]   ;;  %s2031_s4 = inlined_call_operand.hbm [shape: f32[128,384], index: 4, kind: input, shape index: {}]   ;;  %s2032_s5 = inlined_call_operand.hbm [shape: f32[16,128], index: 5, kind: input, shape index: {}]   ;;  %s2033_s6 = inlined_call_operand.hbm [shape: f32[16,128], index: 6, kind: input, shape index: {}]   ;;  %s2034_s7 = inlined_call_operand.hbm [shape: f32[2,8,256], index: 7, kind: output, shape index: {0}]   ;;  %s2035_s8 = inlined_call_operand.hbm [shape: f32[2,2,8,8], index: 8, kind: output, shape index: {1}]  }
   0x1   :  { %2040 = sst [smem:[#allocation20_spill]] %s2031_s4 }
   0x2   :  { %2041 = sst [smem:[#allocation21_spill]] %s2032_s5 }
   0x3   :  { %2042 = sst [smem:[#allocation22_spill]] %s2033_s6 }
   0x4   :  { %14 = vsyncpa [#allocation3], 0 }
   0x5   :  { %16 = vsyncpa [#allocation3 + $0x1], 0 }
   0x6   :  { %17 = vsyncpa [#allocation6], 0 }
   0x7   :  { %19 = vsyncpa [#allocation6 + $0x1], 0 }
   0x8   :  { %20 = vsyncpa [#allocation9], 0 }
   0x9   :  { %21 = vsyncpa [#allocation4], 0 }
   0xa   :  { %23 = vsyncpa [#allocation4 + $0x1], 0 }
   0xb   :  { %24 = vsyncpa [#allocation13], 0 }
   0xc   :  { %26 = vsyncpa [#allocation13 + $0x1], 0  ;;  %s1712_s27 = smov 0   ;;  %s1714_s28 = smov 0  }
   0xd   :  { %s1716_s29 = smov 0   ;;  %s1718_s30 = smov 0  }
   0xe LB: > { %s1733_s9 = sadd.s32 4294967295, %s1649_s30   ;;  %s1186_s10 = sadd.s32 4294967294, %s1649_s30   ;;  %s1649_s30 = sphi %s1718_s30, %s2066_s30   ;;  %s1645_s29 = sphi %s1716_s29, %s2065_s29   ;;  %s1641_s28 = sphi %s1714_s28, %s2064_s28   ;;  %s1637_s27 = sphi %s1712_s27, %s2063_s27  }
   0xf   : > { %p52_p0 = scmp.ne.s32.totalorder %s1641_s28, %s1637_s27  ;;  %p2036_p1 = scmp.eq.s32.totalorder %s1733_s9, 0 }
  0x10   : > { %p213_p3 = scmp.eq.s32.totalorder %s1186_s10, 1  ;;  %p1187_p5 = scmp.ge.s32.totalorder %s1649_s30, 1 }
  0x11   : > { %p1742_p4 = por %p2036_p1, %p52_p0  ;;  %p246_p7 = scmp.lt.s32.totalorder %s1649_s30, 3 }
  0x12   : > { %p1747_p6 = por %p213_p3, %p52_p0  ;;  %s1651_s14 = smov [#allocation7]  }
  0x13   : > { %s2043_s11 = scalar_select %p1742_p4, 1, 0 }
  0x14   : > { %s2044_s12 = scalar_select %p1747_p6, 1, 0 }
  0x15   : > { %p1752_p8 = pnand %p1187_p5, %p246_p7  ;;  %s264_s15 = sshll.u32 %s1651_s14, 4  ;;  %s265_s15 = int_to_ptr.vmem [resolvable:$true] %s264_s15 }
  0x16   : > { %s1652_s17 = smov [#allocation8]   ;;  %s1420_s19 = scalar_lea.vmem %s265_s15, 6144 }
  0x17   : > { %s2045_s13 = scalar_select %p1752_p8, 1, 0 }
  0x18   : > { %p1321_p9 = pneg %p1752_p8  ;;  %s277_s18 = sshll.u32 %s1652_s17, 4  ;;  %s278_s18 = int_to_ptr.vmem [resolvable:$true] %s277_s18 }
  0x19   : > { %p1421_p13 = scmp.ne.s32.totalorder %s265_s15, %s1420_s19  ;;  %p1428_p5 = scmp.lt.s32.totalorder %s265_s15, %s265_s15 }
  0x1a   : > { %p1761_p11 = pnand %p1321_p9, %p2036_p1  ;;  %p1429_p7 = scmp.lt.s32.totalorder %s1420_s19, %s1420_s19 }
  0x1c   : > { %p1411_p12 = pneg %p1761_p11  ;;  %p1430_p10 = por %p1429_p7, %p1428_p5 }
  0x1e   : > { %p1423_p0 = pnand %p1421_p13, %p1411_p12 }
  0x20   : > { %p1424_p3 = pneg %p1423_p0 }
  0x22   : > { %p1431_p9 = pnand %p1430_p10, %p1424_p3 }
  0x24   : > { %1434 = shalt.err (!%p1431_p9)
}
  0x25   : > { %s1653_s20 = smov 384   ;;  %s1654_s21 = smov 24  }
  0x26   : > { %s2047_s4 = sld [smem:[#allocation20_spill]]  ;;  %s1446_s24 = scalar_lea.vmem %s278_s18, 256 }
  0x27   : > { %p1447_p1 = scmp.ne.s32.totalorder %s278_s18, %s1446_s24  ;;  %p1454_p2 = scmp.lt.s32.totalorder %s278_s18, %s278_s18 }
  0x28   : > { %p1455_p6 = scmp.lt.s32.totalorder %s1446_s24, %s1446_s24 }
  0x29   : > { %p1449_p13 = pnand %p1447_p1, %p1411_p12 }
  0x2a   : > { %p1456_p5 = por %p1455_p6, %p1454_p2 }
  0x2b   : > { %p1450_p0 = pneg %p1449_p13 }
  0x2c   : > { %1324 = dma.hbm_to_vmem [thread:$0]  (!%p1761_p11), %s2047_s4, 6144, %s265_s15, [#allocation6], %s1653_s20, %s1653_s20, %s1654_s21  }
  0x2d   : > { %p1457_p10 = pnand %p1456_p5, %p1450_p0 }
  0x2f   : > { %1460 = shalt.err (!%p1457_p10)
}
  0x30   : > { %s1655_s25 = smov 128   ;;  %s1656_s26 = smov 8  }
  0x31   : > { %s2048_s5 = sld [smem:[#allocation21_spill]]  ;;  %s1657_s15 = smov [#allocation10]  }
  0x32   : > { %s290_s17 = sshll.u32 %s1657_s15, 4  ;;  %s1784_s19 = sadd.s32 1, %s1649_s30   ;;  %s291_s17 = int_to_ptr.vmem [resolvable:$true] %s290_s17 }
  0x33   : > { %s1472_s20 = scalar_lea.vmem %s291_s17, 256  ;;  %p1480_p3 = scmp.lt.s32.totalorder %s291_s17, %s291_s17 }
  0x34   : > { %p1473_p1 = scmp.ne.s32.totalorder %s291_s17, %s1472_s20  ;;  %p1481_p7 = scmp.lt.s32.totalorder %s1472_s20, %s1472_s20 }
  0x36   : > { %p1475_p2 = pnand %p1473_p1, %p1411_p12  ;;  %p1482_p9 = por %p1481_p7, %p1480_p3 }
  0x37   : > { %1327 = dma.hbm_to_vmem [thread:$0]  (!%p1761_p11), %s2048_s5, 256, %s278_s18, [#allocation9], %s1655_s25, %s1655_s25, %s1656_s26  }
  0x38   : > { %p1476_p6 = pneg %p1475_p2 }
  0x3a   : > { %p1483_p13 = pnand %p1482_p9, %p1476_p6 }
  0x3c   : > { %1486 = shalt.err (!%p1483_p13)
}
  0x3d   : > { %s2049_s6 = sld [smem:[#allocation22_spill]]  ;;  %s36_s22 = ssub.s32 %s1649_s30, %s1784_s19 }
  0x3e   : > { %s39_s23 = sadd.s32 1, %s1645_s29  ;;  %p37_p12 = scmp.eq.s32.totalorder %s36_s22, 0 }
  0x3f   : > { %p46_p0 = scmp.ne.s32.totalorder %s1645_s29, %s1641_s28  ;;  %p47_p5 = scmp.eq.s32.totalorder %s1649_s30, 0 }
  0x40   : > { %p1348_p10 = scmp.lt.s32.totalorder %s1649_s30, 2  ;;  %p2050_p2 = scmp.eq.s32.totalorder %s1733_s9, 1 }
  0x41   : > { %s1802_s16 = scalar_select %p37_p12, %s1645_s29, %s39_s23  }
  0x42   : > { %p48_p1 = por %p47_p5, %p46_p0  ;;  %p1806_p6 = por %p2050_p2, %p46_p0 }
  0x43   : > { %1330 = dma.hbm_to_vmem [thread:$0]  (!%p1761_p11), %s2049_s6, 256, %s291_s17, [#allocation9], %s1655_s25, %s1655_s25, %s1656_s26  }
  0x44   : > { %s2051_s24 = scalar_select %p1806_p6, 1, 0 }
  0x45   : > { %s1811_s10 = sand.u32 1, %s1645_s29   ;;  %s1217_s25 = sshll.u32 %s1649_s30, 8 }
  0x46   : > { %s1192_s26 = sshll.u32 %s1811_s10, 4  ;;  %s1818_s17 = scalar_lea.hbm %s2027_s0, %s1217_s25 }
  0x47   : > { %s308_s20 = scalar_lea.vmem [#allocation2], %s1192_s26  ;;  %p1820_p11 = pnand %p1348_p10, %p48_p1 }
  0x48   : > { %s316_s21 = sshll.u32 %s308_s20, 4  ;;  %s305_s23 = scalar_lea.sflag [#allocation3], %s1811_s10  ;;  %s317_s21 = int_to_ptr.vmem [resolvable:$true] %s316_s21 }
  0x49   : > { %s1487_s4 = scalar_lea.hbm %s1818_s17, 256  ;;  %p1489_p7 = pneg %p1820_p11 }
  0x4a   : > { %p1488_p3 = scmp.ne.s32.totalorder %s1818_s17, %s1487_s4  ;;  %s1492_s14 = scalar_lea.hbm %s2027_s0, 512 }
  0x4b   : > { %p1493_p12 = scmp.lt.s32.totalorder %s1818_s17, %s2027_s0  ;;  %p1494_p0 = scmp.lt.s32.totalorder %s1492_s14, %s1487_s4 }
  0x4c   : > { %p1490_p9 = pnand %p1489_p7, %p1488_p3 }
  0x4d   : > { %p1495_p5 = por %p1494_p0, %p1493_p12 }
  0x4e   : > { %p1491_p13 = pneg %p1490_p9 }
  0x50   : > { %p1496_p10 = pnand %p1495_p5, %p1491_p13 }
  0x52   : > { %1499 = shalt.err (!%p1496_p10)
}
  0x53   : > { %s1500_s22 = scalar_lea.vmem %s317_s21, 256  ;;  %s1658_s5 = smov [#allocation2]  }
  0x54   : > { %p1501_p1 = scmp.ne.s32.totalorder %s317_s21, %s1500_s22  ;;  %s1505_s6 = sshll.u32 %s1658_s5, 4  ;;  %s1506_s6 = int_to_ptr.vmem [resolvable:$false] %s1505_s6 }
  0x55   : > { %s1507_s25 = scalar_lea.vmem %s1506_s6, 512  ;;  %p1508_p9 = scmp.lt.s32.totalorder %s317_s21, %s1506_s6 }
  0x56   : > { %p1503_p2 = pnand %p1501_p1, %p1489_p7  ;;  %p1509_p6 = scmp.lt.s32.totalorder %s1507_s25, %s1500_s22 }
  0x58   : > { %p1504_p3 = pneg %p1503_p2  ;;  %p1510_p4 = por %p1509_p6, %p1508_p9 }
  0x5a   : > { %p1511_p8 = pnand %p1510_p4, %p1504_p3 }
  0x5c   : > { %1514 = shalt.err (!%p1511_p8)
}
  0x5d   : > { %1334 = dma.hbm_to_vmem [thread:$0]  (!%p1820_p11), %s1818_s17, 256, %s317_s21, %s305_s23  }
  0x5e   : > { %s1195_s4 = sshll.u32 %s1649_s30, 4  ;;  %s326_s6 = scalar_lea.vmem [#allocation5], %s1811_s10 }
  0x5f   : > { %s1850_s5 = scalar_lea.hbm %s2028_s1, %s1195_s4  ;;  %s333_s22 = sshll.u32 %s326_s6, 4  ;;  %s334_s22 = int_to_ptr.vmem [resolvable:$true] %s333_s22 }
  0x60   : > { %s2053_s15 = sand.u32 1, %s1649_s30   ;;  %s1515_s25 = scalar_lea.hbm %s1850_s5, 16 }
  0x61   : > { %s324_s20 = scalar_lea.sflag [#allocation6], %s2053_s15  ;;  %p1516_p4 = scmp.ne.s32.totalorder %s1850_s5, %s1515_s25 }
  0x62   : > { %s1520_s23 = scalar_lea.hbm %s2028_s1, 32  ;;  %p1521_p13 = scmp.lt.s32.totalorder %s1850_s5, %s2028_s1 }
  0x63   : > { %p1518_p8 = pnand %p1516_p4, %p1489_p7  ;;  %p1522_p12 = scmp.lt.s32.totalorder %s1520_s23, %s1515_s25 }
  0x65   : > { %p1519_p6 = pneg %p1518_p8  ;;  %p1523_p0 = por %p1522_p12, %p1521_p13 }
  0x67   : > { %p1524_p5 = pnand %p1523_p0, %p1519_p6 }
  0x69   : > { %1527 = shalt.err (!%p1524_p5)
}
  0x6a   : > { %s1528_s10 = scalar_lea.vmem %s334_s22, 16  ;;  %s1659_s14 = smov [#allocation5]  }
  0x6b   : > { %p1529_p10 = scmp.ne.s32.totalorder %s334_s22, %s1528_s10  ;;  %s1533_s6 = sshll.u32 %s1659_s14, 4  ;;  %s1534_s6 = int_to_ptr.vmem [resolvable:$false] %s1533_s6 }
  0x6c   : > { %s1535_s15 = scalar_lea.vmem %s1534_s6, 32  ;;  %p1536_p3 = scmp.lt.s32.totalorder %s334_s22, %s1534_s6 }
  0x6d   : > { %p1531_p1 = pnand %p1529_p10, %p1489_p7  ;;  %p1537_p9 = scmp.lt.s32.totalorder %s1535_s15, %s1528_s10 }
  0x6f   : > { %p1532_p2 = pneg %p1531_p1  ;;  %p1538_p4 = por %p1537_p9, %p1536_p3 }
  0x71   : > { %p1539_p8 = pnand %p1538_p4, %p1532_p2 }
  0x73   : > { %1542 = shalt.err (!%p1539_p8)
}
  0x74   : > { %1337 = dma.hbm_to_vmem [thread:$0]  (!%p1820_p11), %s1850_s5, 16, %s334_s22, %s324_s20  }
  0x75   : > { %p2054_p6 = scmp.ne.s32.totalorder %s2045_s13, 0 }
  0x76   : > { %s1876_s25 = sand.u32 (!%p2054_p6), 1, %s1641_s28   ;;  %p2055_p7 = scmp.ne.s32.totalorder (!%p2054_p6), %s2043_s11, 0 }
  0x77   : > { %342 = sbr.rel (%p2054_p6) target bundleno = 1479 (0x5c7), region = 48  ;;  %s1879_s17 = sshll.u32 (!%p2054_p6), %s1876_s25, 4 }
  0x78   : > { %s345_s21 = scalar_lea.sflag (!%p2054_p6), [#allocation3], %s1876_s25  ;;  %s348_s23 = scalar_lea.vmem (!%p2054_p6), [#allocation2], %s1879_s17 }
  0x7c   : > { %1612 = dma.done.wait (%p2055_p7), %s345_s21, 256  }
  0x7d   : > { %1614 = vsyncadd (%p2055_p7), %s345_s21, 4294967040  ;;  %s353_s13 = sand.u32 1, %s1733_s9   ;;  %s356_s5 = scalar_lea.vmem [#allocation5], %s1876_s25 }
  0x7e   : > { %s354_s18 = scalar_lea.sflag [#allocation6], %s353_s13 }
  0x7f   : > { %1616 = dma.done.wait (%p2055_p7), %s354_s18, 16  }
  0x80   : > { %1618 = vsyncadd (%p2055_p7), %s354_s18, 4294967280  ;;  %p2056_p11 = scmp.eq.s32.totalorder %s1733_s9, 0 }
  0x82   : > { %1620 = dma.done.wait (%p2056_p11), [#allocation6], 6144   ;;  %p2057_p13 = pmov %p2056_p11 }
  0x83   : > { %p2058_p12 = pmov %p2056_p11 }
  0x84   : > { %1622 = vsyncadd (%p2057_p13), [#allocation6], 4294961152 }
  0x85   : > { %1624 = dma.done.wait (%p2058_p12), [#allocation9], 512   ;;  %p2059_p0 = pmov %p2056_p11 }
  0x86   : > { %v410_v0 = vld [vmem:[%s348_s23] sm:$0xff]  ;;  %v411_v1 = vld [vmem:[%s348_s23 + $0x8] sm:$0xff]  ;;  %v1660_v56 = vmov 0.0   ;;  %vm1661_vm0 = vmmov 0   ;;  %s1662_s26 = smov 64   ;;  %vm754_vm1 = vcmask 64512  }
  0x87   : > { %1626 = vsyncadd (%p2059_p0), [#allocation9], 4294966784  ;;  %412 = vadd.xlane.f32.xlu0 %v410_v0  ;;  %v499_v2 = vld [vmem:[#allocation7 + $0x170] sm:$0xff]  ;;  %v498_v3 = vld [vmem:[#allocation7 + $0x168] sm:$0xff]  ;;  %565 = vmatprep.mubr.f32.mxu0 %v1660_v56  ;;  %s409_s10 = scalar_lea.vmem [#allocation12], %s1879_s17  ;;  %s1218_s14 = sshll.u32 %s1733_s9, 8 }
  0x88   : > { %v496_v4 = vld [vmem:[#allocation7 + $0x158] sm:$0xff]  ;;  %501 = vmatprep.subr.mxu0 %v499_v2  ;;  %v495_v5 = vld [vmem:[#allocation7 + $0x150] sm:$0xff]  ;;  %v493_v7 = vld [vmem:[#allocation7 + $0x140] sm:$0xff]  ;;  %s1033_s6 = sshll.u32 %s409_s10, 4  ;;  %s1951_s23 = scalar_lea.hbm %s2035_s8, %s1218_s14  ;;  %s1953_s6 = int_to_ptr.vmem [resolvable:$true] %s1033_s6 }
  0x89   : > { %v500_v6 = vld [vmem:[#allocation7 + $0x178] sm:$0xff]  ;;  %502 = vmatpush1.msra.mxu0 %v498_v3  ;;  %v497_v8 = vld [vmem:[#allocation7 + $0x160] sm:$0xff]  ;;  %v490_v10 = vld [vmem:[#allocation7 + $0x128] sm:$0xff]  ;;  %s1006_s13 = scalar_lea.sflag [#allocation13], %s1876_s25  ;;  %s1543_s18 = scalar_lea.vmem %s1953_s6, 256 }
  0x8a   : > { %1246 = vmatprep.subr.mxu1 %v500_v6  ;;  %503 = vmatprep.subr.mxu0 %v496_v4  ;;  %v492_v9 = vld [vmem:[#allocation7 + $0x138] sm:$0xff]  ;;  %v489_v11 = vld [vmem:[#allocation7 + $0x120] sm:$0xff]  ;;  %v487_v20 = vld [vmem:[#allocation7 + $0x110] sm:$0xff]  ;;  %p1544_p5 = scmp.ne.s32.totalorder %s1953_s6, %s1543_s18  ;;  %p2060_p10 = scmp.ne.s32.totalorder %s2051_s24, 0 }
  0x8b   : > { %414 = vadd.xlane.f32.xlu0 %v411_v1  ;;  %1247 = vmatpush3.msra.mxu1 %v500_v6  ;;  %v494_v21 = vld [vmem:[#allocation7 + $0x148] sm:$0xff]  ;;  %v484_v23 = vld [vmem:[#allocation7 + $0xf8] sm:$0xff]  ;;  %v491_v24 = vld [vmem:[#allocation7 + $0x130] sm:$0xff] }
  0x8c   : > { %504 = vmatpush1.msra.mxu0 %v495_v5  ;;  %1248 = vmatprep.subr.mxu1 %v497_v8  ;;  %v486_v22 = vld [vmem:[#allocation7 + $0x108] sm:$0xff]  ;;  %v483_v25 = vld [vmem:[#allocation7 + $0xf0] sm:$0xff]  ;;  %v481_v26 = vld [vmem:[#allocation7 + $0xe0] sm:$0xff]  ;;  %p1545_p1 = pnand %p1544_p5, %p2060_p10 }
  0x8d   : > { %505 = vmatprep.subr.mxu0 %v493_v7  ;;  %1249 = vmatpush3.msra.mxu1 %v497_v8  ;;  %v488_v27 = vld [vmem:[#allocation7 + $0x118] sm:$0xff]  ;;  %v478_v29 = vld [vmem:[#allocation7 + $0xc8] sm:$0xff]  ;;  %v485_v30 = vld [vmem:[#allocation7 + $0x100] sm:$0xff] }
  0x8e   : > { %506 = vmatpush1.msra.mxu0 %v492_v9  ;;  %1250 = vmatprep.subr.mxu1 %v494_v21  ;;  %v480_v28 = vld [vmem:[#allocation7 + $0xd8] sm:$0xff]  ;;  %v477_v31 = vld [vmem:[#allocation7 + $0xc0] sm:$0xff]  ;;  %v475_v32 = vld [vmem:[#allocation7 + $0xb0] sm:$0xff]  ;;  %p1546_p2 = pneg %p1545_p1 }
  0x8f   : > { %507 = vmatprep.subr.mxu0 %v490_v10  ;;  %1251 = vmatpush3.msra.mxu1 %v494_v21  ;;  %v482_v33 = vld [vmem:[#allocation7 + $0xe8] sm:$0xff]  ;;  %v472_v35 = vld [vmem:[#allocation7 + $0x98] sm:$0xff]  ;;  %v479_v36 = vld [vmem:[#allocation7 + $0xd0] sm:$0xff] }
  0x90   : > { %508 = vmatpush1.msra.mxu0 %v489_v11  ;;  %1252 = vmatprep.subr.mxu1 %v491_v24  ;;  %v474_v34 = vld [vmem:[#allocation7 + $0xa8] sm:$0xff]  ;;  %v471_v37 = vld [vmem:[#allocation7 + $0x90] sm:$0xff]  ;;  %v469_v38 = vld [vmem:[#allocation7 + $0x80] sm:$0xff] }
  0x91   : > { %509 = vmatprep.subr.mxu0 %v487_v20  ;;  %1253 = vmatpush3.msra.mxu1 %v491_v24  ;;  %v476_v39 = vld [vmem:[#allocation7 + $0xb8] sm:$0xff]  ;;  %v466_v41 = vld [vmem:[#allocation7 + $0x68] sm:$0xff]  ;;  %v473_v42 = vld [vmem:[#allocation7 + $0xa0] sm:$0xff] }
  0x92   : > { %510 = vmatpush1.msra.mxu0 %v486_v22  ;;  %1254 = vmatprep.subr.mxu1 %v488_v27  ;;  %v468_v40 = vld [vmem:[#allocation7 + $0x78] sm:$0xff]  ;;  %v465_v43 = vld [vmem:[#allocation7 + $0x60] sm:$0xff]  ;;  %v463_v44 = vld [vmem:[#allocation7 + $0x50] sm:$0xff] }
  0x93   : > { %511 = vmatprep.subr.mxu0 %v484_v23  ;;  %1255 = vmatpush3.msra.mxu1 %v488_v27  ;;  %v470_v45 = vld [vmem:[#allocation7 + $0x88] sm:$0xff]  ;;  %v460_v47 = vld [vmem:[#allocation7 + $0x38] sm:$0xff]  ;;  %v467_v48 = vld [vmem:[#allocation7 + $0x70] sm:$0xff] }
  0x94   : > { %512 = vmatpush1.msra.mxu0 %v483_v25  ;;  %1256 = vmatprep.subr.mxu1 %v485_v30  ;;  %v462_v46 = vld [vmem:[#allocation7 + $0x48] sm:$0xff]  ;;  %v459_v49 = vld [vmem:[#allocation7 + $0x30] sm:$0xff]  ;;  %v457_v50 = vld [vmem:[#allocation7 + $0x20] sm:$0xff] }
  0x95   : > { %513 = vmatprep.subr.mxu0 %v481_v26  ;;  %1257 = vmatpush3.msra.mxu1 %v485_v30  ;;  %v464_v51 = vld [vmem:[#allocation7 + $0x58] sm:$0xff]  ;;  %v454_v53 = vld [vmem:[#allocation7 + $0x8] sm:$0xff]  ;;  %v461_v54 = vld [vmem:[#allocation7 + $0x40] sm:$0xff] }
  0x96   : > { %514 = vmatpush1.msra.mxu0 %v480_v28  ;;  %1258 = vmatprep.subr.mxu1 %v482_v33  ;;  %v456_v52 = vld [vmem:[#allocation7 + $0x18] sm:$0xff]  ;;  %v453_v55 = vld [vmem:[#allocation7] sm:$0xff]  ;;  %v458_v57 = vld [vmem:[#allocation7 + $0x28] sm:$0xff] }
  0x97   : > { %515 = vmatprep.subr.mxu0 %v478_v29  ;;  %1259 = vmatpush3.msra.mxu1 %v482_v33  ;;  %v455_v58 = vld [vmem:[#allocation7 + $0x10] sm:$0xff]  ;;  %v1203_v2 = vld [vmem:[%s2029_s2] ss:$0 sm:$0xff]  ;;  %v654_v27 = vld [vmem:[#allocation8 + $0x8] sm:$0xff] }
  0x98   : > { %516 = vmatpush1.msra.mxu0 %v477_v31  ;;  %1260 = vmatprep.subr.mxu1 %v479_v36  ;;  %v1204_v4 = vld [vmem:[%s2030_s3] ss:$0 sm:$0xff] }
  0x99   : > { %517 = vmatprep.subr.mxu0 %v475_v32  ;;  %1261 = vmatpush3.msra.mxu1 %v479_v36  ;;  %v656_v24 = vld [vmem:[#allocation10 + $0x8] sm:$0xff] }
  0x9a   : > { %518 = vmatpush1.msra.mxu0 %v474_v34  ;;  %1262 = vmatprep.subr.mxu1 %v476_v39 }
  0x9b   : > { %519 = vmatprep.subr.mxu0 %v472_v35  ;;  %1263 = vmatpush3.msra.mxu1 %v476_v39 }
  0x9c   : > { %520 = vmatpush1.msra.mxu0 %v471_v37  ;;  %1264 = vmatprep.subr.mxu1 %v473_v42  ;;  %v1205_v37 = vld [vmem:[%s356_s5] ss:$0 sm:$0xff]  ;;  %s1663_s5 = smov [#allocation12]  }
  0x9d   : > { %521 = vmatprep.subr.mxu0 %v469_v38  ;;  %1265 = vmatpush3.msra.mxu1 %v473_v42  ;;  %s1547_s11 = sshll.u32 %s1663_s5, 4  ;;  %s1548_s11 = int_to_ptr.vmem [resolvable:$false] %s1547_s11 }
  0x9e   : > { %522 = vmatpush1.msra.mxu0 %v468_v40  ;;  %1266 = vmatprep.subr.mxu1 %v470_v45  ;;  %s1549_s22 = scalar_lea.vmem %s1548_s11, 512  ;;  %p1550_p3 = scmp.lt.s32.totalorder %s1953_s6, %s1548_s11 }
  0x9f   : > { %523 = vmatprep.subr.mxu0 %v466_v41  ;;  %1267 = vmatpush3.msra.mxu1 %v470_v45  ;;  %p1551_p9 = scmp.lt.s32.totalorder %s1549_s22, %s1543_s18 }
  0xa0   : > { %524 = vmatpush1.msra.mxu0 %v465_v43  ;;  %1268 = vmatprep.subr.mxu1 %v467_v48 }
  0xa1   : > { %525 = vmatprep.subr.mxu0 %v463_v44  ;;  %1269 = vmatpush3.msra.mxu1 %v467_v48  ;;  %p1552_p4 = por %p1551_p9, %p1550_p3 }
  0xa2   : > { %526 = vmatpush1.msra.mxu0 %v462_v46  ;;  %1270 = vmatprep.subr.mxu1 %v464_v51 }
  0xa3   : > { %527 = vmatprep.subr.mxu0 %v460_v47  ;;  %1271 = vmatpush3.msra.mxu1 %v464_v51  ;;  %p1553_p8 = pnand %p1552_p4, %p1546_p2 }
  0xa4   : > { %528 = vmatpush1.msra.mxu0 %v459_v49  ;;  %1272 = vmatprep.subr.mxu1 %v461_v54 }
  0xa5   : > { %529 = vmatprep.subr.mxu0 %v457_v50  ;;  %1273 = vmatpush3.msra.mxu1 %v461_v54 }
  0xa6   : > { %530 = vmatpush1.msra.mxu0 %v456_v52  ;;  %1274 = vmatprep.subr.mxu1 %v458_v57 }
  0xa7   : > { %531 = vmatprep.subr.mxu0 %v454_v53  ;;  %1275 = vmatpush3.msra.mxu1 %v458_v57 }
  0xa8   : > { %532 = vmatpush1.msra.mxu0 %v453_v55  ;;  %1276 = vmatprep.subr.mxu1 %v455_v58 }
  0xa9   : > { %1286 = vmatprep.subr.mxu0 %v1660_v56  ;;  %1277 = vmatpush3.msra.mxu1 %v455_v58 }
  0xaa   : > { %1281 = vmatprep.subr.mxu1 %v1660_v56 }
 0x110   : > { %v413_v12 = vpop.xlane.xlu0 %412 }
 0x111   : > { %v417_v13 = vmul.f32 0.0078125, %v413_v12 }
 0x113   : > { %v1901_v14 = vsub.f32 %v410_v0, %v417_v13 }
 0x114   : > { %v415_v15 = vpop.xlane.xlu0 %414 }
 0x115   : > { %v418_v16 = vmul.f32 0.0078125, %v415_v15  ;;  %v421_v17 = vmul.f32 %v1901_v14, %v1901_v14 }
 0x117   : > { %v1905_v18 = vsub.f32 %v411_v1, %v418_v16  ;;  %423 = vadd.xlane.f32.xlu1 %v421_v17  ;;  %v655_v17 = vld [vmem:[#allocation10] sm:$0xff] }
 0x119   : > { %v422_v19 = vmul.f32 %v1905_v18, %v1905_v18 }
 0x11b   : > { %425 = vadd.xlane.f32.xlu1 %v422_v19  ;;  %v653_v19 = vld [vmem:[#allocation8] sm:$0xff] }
 0x1a0   : > { %v424_v59 = vpop.xlane.xlu1 %423 }
 0x1a1   : > { %v427_v60 = vmul.f32 0.0078125, %v424_v59 }
 0x1a3   : > { %v429_v61 = vadd.f32 1e-05, %v427_v60 }
 0x1a4   : > { %v426_v62 = vpop.xlane.xlu1 %425 }
 0x1a5   : > { %1397 = vrsqrt.f32 %v429_v61  ;;  %v428_v63 = vmul.f32 0.0078125, %v426_v62 }
 0x1a7   : > { %v430_v0 = vadd.f32 1e-05, %v428_v63 }
 0x1a9   : > { %1399 = vrsqrt.f32 %v430_v0 }
 0x1b2   : > { %v1398_v1 = vpop.eup %1397 }
 0x1b3   : > { %v433_v3 = vmul.f32 %v1398_v1, %v1901_v14 }
 0x1b5   : > { %v442_v5 = vmul.f32 %v1203_v2, %v433_v3 }
 0x1b6   : > { %v1400_v6 = vpop.eup %1399 }
 0x1b7   : > { %v451_v7 = vadd.f32 %v1204_v4, %v442_v5  ;;  %v434_v8 = vmul.f32 %v1400_v6, %v1905_v18 }
 0x1b9   : > { %566 = vmatmul.mubr.f32.vlgmr.msra.gmra.mxu0 %v451_v7  ;;  %1278 = vmatprep.mubr.f32.mxu1 %v451_v7  ;;  %v443_v9 = vmul.f32 %v1203_v2, %v434_v8 }
 0x1ba   : > { %571 = vmatprep.mubr.f32.mxu0 %v1660_v56 }
 0x1bb   : > { %v452_v10 = vadd.f32 %v1204_v4, %v443_v9 }
 0x1bd   : > { %572 = vmatmul.mubr.f32.gmra.mxu0 %v452_v10  ;;  %1279 = vmatmul.mubr.f32.vlgmr.msra.gmra.mxu1 %v452_v10 }
 0x1be   : > { %1283 = vmatprep.mubr.msk.f32.mxu1 %vm1661_vm0, %v1660_v56  ;;  %1288 = vmatprep.mubr.msk.f32.mxu0 %vm1661_vm0, %v1660_v56 }
 0x279   : > { %v567_v11 = vpop.f32.mrf.mxu0 }
 0x27a   : > { %659 = vrot.lane.b32.xlu1 %v567_v11, %s1662_s26  ;;  %v657_v26 = vmul.f32 %v653_v19, %v567_v11 }
 0x27b   : > { %v569_v12 = vpop.f32.mrf.mxu0 }
 0x27c   : > { %669 = vrot.lane.b32.xlu0 %v569_v12, %s1662_s26  ;;  %v667_v21 = vmul.f32 %v653_v19, %v569_v12 }
 0x27d   : > { %v573_v13 = vpop.f32.mrf.mxu0  ;;  %v1925_v14 = vpop.f32.mrf.mxu1 }
 0x27e   : > { %v658_v34 = vmul.f32 %v654_v27, %v573_v13 }
 0x27f   : > { %v575_v15 = vpop.f32.mrf.mxu0  ;;  %v644_v16 = vpop.f32.mrf.mxu1 }
 0x280   : > { %1287 = vmatpush3.msra.mxu0 %v644_v16  ;;  %671 = vrot.lane.b32.xlu1 %v575_v15, %s1662_s26  ;;  %v668_v29 = vmul.f32 %v654_v27, %v575_v15 }
 0x281   : > { %1296 = vmatprep.subr.mxu0 %v1660_v56 }
 0x284   : > { %661 = vrot.lane.b32.xlu1 %v573_v13, %s1662_s26 }
 0x2ec   : > { %v660_v18 = vpop.permute.xlu1 %659 }
 0x2ed   : > { %v663_v23 = vmul.f32 %v660_v18, %v655_v17 }
 0x2ee   : > { %v670_v20 = vpop.permute.xlu0 %669 }
 0x2ef   : > { %v673_v22 = vmul.f32 %v670_v20, %v655_v17  ;;  %v665_v31 = vadd.f32 %v663_v23, %v657_v26 }
 0x2f1   : > { %v675_v25 = vadd.f32 %v673_v22, %v667_v21 }
 0x2f2   : > { %v672_v28 = vpop.permute.xlu1 %671 }
 0x2f3   : > { %v674_v30 = vmul.f32 %v672_v28, %v656_v24  ;;  %1282 = vmatpush3.xpose.msra.mxu1 %v675_v25 }
 0x2f4   : > { %1291 = vmatprep.subr.mxu1 %v1660_v56 }
 0x2f5   : > { %v676_v32 = vadd.f32 %v674_v30, %v668_v29 }
 0x2f6   : > { %v662_v33 = vpop.permute.xlu1 %661  ;;  %1284 = vmatmul.mubr.f32.vlgmr.msra.gmra.mxu1 %v665_v31 }
 0x2f7   : > { %v664_v35 = vmul.f32 %v662_v33, %v656_v24  ;;  %1292 = vmatpush3.xpose.msra.mxu1 %v676_v32  ;;  %1293 = vmatprep.mubr.msk.f32.mxu1 %vm1661_vm0, %v1660_v56 }
 0x2f9   : > { %v666_v36 = vadd.f32 %v664_v35, %v658_v34 }
 0x2fb   : > { %1294 = vmatmul.mubr.f32.vlgmr.msra.gmra.mxu1 %v666_v36 }
 0x3b6   : > { %v750_v38 = vpop.f32.mrf.mxu1 }
 0x3b7   : > { %v751_v39 = vadd.f32 %v1205_v37, %v750_v38 }
 0x3b8   : > { %v1285_v40 = vpop.f32.mrf.mxu1 }
 0x3b9   : > { %v755_v41 = vsel %vm754_vm1, %v751_v39, -inf }
 0x3ba   : > { %756 = vmax.xlane.f32.xlu0 %v755_v41 }
 0x3bb   : > { %v907_v42 = vpop.f32.mrf.mxu1 }
 0x3bc   : > { %v908_v43 = vadd.f32 %v1205_v37, %v907_v42 }
 0x3bd   : > { %v1295_v44 = vpop.f32.mrf.mxu1 }
 0x3be   : > { %v911_v45 = vsel %vm754_vm1, %v908_v43, -inf }
 0x3bf   : > { %912 = vmax.xlane.f32.xlu1 %v911_v45 }
 0x443   : > { %v757_v46 = vpop.xlane.xlu0 %756 }
 0x444   : > { %v758_v47 = vsub.f32 %v751_v39, %v757_v46 }
 0x446   : > { %v759_v48 = vmul.f32 1.442695, %v758_v47 }
 0x448   : > { %1401 = vpow2.f32 %v759_v48  ;;  %v913_v49 = vpop.xlane.xlu1 %912 }
 0x449   : > { %v914_v50 = vsub.f32 %v908_v43, %v913_v49 }
 0x44b   : > { %v915_v51 = vmul.f32 1.442695, %v914_v50 }
 0x44d   : > { %1403 = vpow2.f32 %v915_v51 }
 0x455   : > { %v1402_v52 = vpop.eup %1401 }
 0x456   : > { %v761_v53 = vsel %vm754_vm1, %v1402_v52, 0.0 }
 0x457   : > { %762 = vadd.xlane.f32.xlu0 %v761_v53 }
 0x45a   : > { %v1404_v54 = vpop.eup %1403 }
 0x45b   : > { %v917_v55 = vsel %vm754_vm1, %v1404_v54, 0.0 }
 0x45c   : > { %918 = vadd.xlane.f32.xlu0 %v917_v55 }
 0x4e0   : > { %v763_v57 = vpop.xlane.xlu0 %762 }
 0x4e1   : > { %v764_v58 = vadd.f32 1e-07, %v763_v57 }
 0x4e3   : > { %1405 = vrcp.f32 %v764_v58 }
 0x4e5   : > { %v919_v59 = vpop.xlane.xlu0 %918 }
 0x4e6   : > { %v920_v60 = vadd.f32 1e-07, %v919_v59 }
 0x4e8   : > { %1407 = vrcp.f32 %v920_v60 }
 0x4f0   : > { %v1406_v61 = vpop.eup %1405 }
 0x4f1   : > { %v766_v62 = vmul.f32 %v1406_v61, %v1402_v52 }
 0x4f3   : > { %1289 = vmatmul.mubr.msk.f32.vlgmr.msra.gmra.mxu0 %vm754_vm1, %v766_v62  ;;  %767 = vst.msk [vmem:[%s409_s10] sm:$0xff] %vm754_vm1, %v766_v62 }
 0x4f4   : > { %1297 = vmatpush3.msra.mxu0 %v1925_v14  ;;  %1298 = vmatprep.mubr.msk.f32.mxu0 %vm1661_vm0, %v1660_v56 }
 0x4f5   : > { %v1408_v63 = vpop.eup %1407 }
 0x4f6   : > { %v922_v0 = vmul.f32 %v1408_v63, %v1404_v54 }
 0x4f8   : > { %1299 = vmatmul.mubr.msk.f32.vlgmr.msra.gmra.mxu0 %vm754_vm1, %v922_v0  ;;  %1207 = vst.msk [vmem:[%s409_s10 + $0x8] sm:$0xff] %vm754_vm1, %v922_v0 }
 0x4f9   : > { %1556 = shalt.err (!%p1553_p8)
}
 0x4fa   : > { %s1557_s20 = scalar_lea.hbm %s1951_s23, 256  ;;  %s1561_s10 = scalar_lea.hbm %s2035_s8, 512 }
 0x4fb   : > { %p1558_p6 = scmp.ne.s32.totalorder %s1951_s23, %s1557_s20  ;;  %p1562_p13 = scmp.lt.s32.totalorder %s1951_s23, %s2035_s8 }
 0x4fc   : > { %p1563_p12 = scmp.lt.s32.totalorder %s1561_s10, %s1557_s20 }
 0x4fd   : > { %p1559_p7 = pnand %p1558_p6, %p2060_p10 }
 0x4fe   : > { %p1564_p0 = por %p1563_p12, %p1562_p13 }
 0x4ff   : > { %p1560_p11 = pneg %p1559_p7 }
 0x501   : > { %p1565_p5 = pnand %p1564_p0, %p1560_p11 }
 0x503   : > { %1568 = shalt.err (!%p1565_p5)
}
 0x504   : > { %s1664_s18 = smov 128   ;;  %s1665_s5 = smov 8  }
 0x505   : > { %1318 = dma.vmem_to_hbm [thread:$0]  (%p2060_p10), %s1953_s6, 256, %s1951_s23, %s1006_s13, %s1664_s18, %s1664_s18, %s1665_s5  }
 0x506   : > { %s402_s11 = scalar_lea.vmem [#allocation11], %s1879_s17  ;;  %s1986_s26 = scalar_lea.hbm %s2034_s7, %s1218_s14 }
 0x507   : > { %s1020_s22 = sshll.u32 %s402_s11, 4  ;;  %s1001_s6 = scalar_lea.sflag [#allocation4], %s1876_s25  ;;  %s1979_s22 = int_to_ptr.vmem [resolvable:$true] %s1020_s22 }
 0x508   : > { %s1569_s23 = scalar_lea.vmem %s1979_s22, 256  ;;  %s1666_s17 = smov [#allocation11]  }
 0x509   : > { %p1570_p1 = scmp.ne.s32.totalorder %s1979_s22, %s1569_s23  ;;  %s1573_s13 = sshll.u32 %s1666_s17, 4  ;;  %s1574_s13 = int_to_ptr.vmem [resolvable:$false] %s1573_s13 }
 0x50a   : > { %s1575_s9 = scalar_lea.vmem %s1574_s13, 512  ;;  %p1576_p9 = scmp.lt.s32.totalorder %s1979_s22, %s1574_s13 }
 0x50b   : > { %p1571_p2 = pnand %p1570_p1, %p2060_p10  ;;  %p1577_p4 = scmp.lt.s32.totalorder %s1575_s9, %s1569_s23 }
 0x50d   : > { %p1572_p3 = pneg %p1571_p2  ;;  %p1578_p8 = por %p1577_p4, %p1576_p9 }
 0x50f   : > { %p1579_p6 = pnand %p1578_p8, %p1572_p3 }
 0x5b3   : > { %v837_v56 = vpop.f32.mrf.mxu0 }
 0x5b4   : > { %998 = vst [vmem:[%s402_s11] sm:$0xff] %v837_v56 }
 0x5b5   : > { %v1290_v1 = vpop.f32.mrf.mxu0 }
 0x5b8   : > { %v994_v2 = vpop.f32.mrf.mxu0 }
 0x5b9   : > { %999 = vst [vmem:[%s402_s11 + $0x8] sm:$0xff] %v994_v2 }
 0x5ba   : > { %v1300_v3 = vpop.f32.mrf.mxu0 }
 0x5bb   : > { %1582 = shalt.err (!%p1579_p6)
}
 0x5bc   : > { %s1583_s14 = scalar_lea.hbm %s1986_s26, 256  ;;  %s1587_s15 = scalar_lea.hbm %s2034_s7, 512 }
 0x5bd   : > { %p1584_p7 = scmp.ne.s32.totalorder %s1986_s26, %s1583_s14  ;;  %p1588_p12 = scmp.lt.s32.totalorder %s1986_s26, %s2034_s7 }
 0x5be   : > { %p1589_p0 = scmp.lt.s32.totalorder %s1587_s15, %s1583_s14 }
 0x5bf   : > { %p1585_p11 = pnand %p1584_p7, %p2060_p10 }
 0x5c0   : > { %p1590_p5 = por %p1589_p0, %p1588_p12 }
 0x5c1   : > { %p1586_p13 = pneg %p1585_p11 }
 0x5c3   : > { %p1591_p1 = pnand %p1590_p5, %p1586_p13 }
 0x5c5   : > { %1594 = shalt.err (!%p1591_p1)
}
 0x5c6   : > { %1317 = dma.vmem_to_hbm [thread:$0]  (%p2060_p10), %s1979_s22, 256, %s1986_s26, %s1001_s6  }
 0x5c7 PF: > { %s1048_s5 = sand.u32 1, %s1637_s27   ;;  %p2061_p2 = scmp.ne.s32.totalorder %s2044_s12, 0 }
 0x5c8   : > { %p2062_p3 = scmp.ge.s32.totalorder %s1649_s30, 2  ;;  %s1049_s11 = scalar_lea.sflag [#allocation4], %s1048_s5 }
 0x5ca   : > { %p1339_p9 = pnand %p2062_p3, %p2061_p2 }
 0x5cc   : > { %p1340_p4 = pneg %p1339_p9 }
 0x5ce   : > { %1628 = dma.done.wait (%p1340_p4), %s1049_s11, 256  }
 0x5cf   : > { %1630 = vsyncadd (%p1340_p4), %s1049_s11, 4294967040  ;;  %s1058_s20 = scalar_lea.sflag [#allocation13], %s1048_s5 }
 0x5d0   : > { %1632 = dma.done.wait (%p1340_p4), %s1058_s20, 256  }
 0x5d1   : > { %1634 = vsyncadd (%p1340_p4), %s1058_s20, 4294967040  ;;  %p29_p10 = scmp.ge.s32.totalorder %s1784_s19, 4   ;;  %s2063_s27 = smov %s1641_s28 }
 0x5d2   : > { %s2064_s28 = smov %s1645_s29  ;;  %s2065_s29 = smov %s1802_s16 }
 0x5d3   : > { %s2066_s30 = smov %s1784_s19  ;;  %31 = sbr.rel (!%p29_p10) target bundleno = 14 (0xe), region = 136 }
 0x5d8   :  { %1063 = vsyncpa [#allocation3], 1 }
 0x5d9   :  { %1065 = vsyncpa [#allocation3 + $0x1], 1 }
 0x5da   :  { %1066 = vsyncpa [#allocation6], 1 }
 0x5db   :  { %1068 = vsyncpa [#allocation6 + $0x1], 1 }
 0x5dc   :  { %1069 = vsyncpa [#allocation9], 1 }
 0x5dd   :  { %1070 = vsyncpa [#allocation4], 1 }
 0x5de   :  { %1072 = vsyncpa [#allocation4 + $0x1], 1 }
 0x5df   :  { %1073 = vsyncpa [#allocation13], 1 }
 0x5e0   :  { %1075 = vsyncpa [#allocation13 + $0x1], 1 }

</bundles_post_ra>
